<compile_context>
chip_gen: v5e
topology: v5e:2x2
jax: 0.10.0
libtpu: 0.0.40
codegen_flags: <defaults>
</compile_context>

<pallas_src>
import functools

import jax
import jax.numpy as jnp
from jax import lax
from jax.experimental import pallas as pl
from jax.experimental.pallas import tpu as pltpu


# ----------------------------- helpers -------------------------------------------------
def _vmem_limit_bytes():
    """~80% of the physical per-core VMEM (fallback: 64 MiB -> 51 MiB, safe everywhere)."""
    cap = 64 << 20
    try:
        cap = int(pltpu.get_tpu_info().vmem_capacity_bytes)
    except Exception:
        pass
    return max(16 << 20, int(cap * 0.8))


def _pick_tile(total, cap):
    """Largest multiple of 128 that divides `total` and is <= cap; `total` if small.
    Falls back to one full block if no 128-multiple divisor exists."""
    if total <= cap:
        return total
    best = None
    t = 128
    while t <= cap:
        if total % t == 0:
            best = t
        t += 128
    # TODO(synk): ragged spatial sizes with no 128-multiple divisor fall back to a single
    # full block (correct, but may be VMEM-heavy for very large C*H*W).
    return best if best is not None else total


def _largest_divisor_leq(n, cap):
    best = 1
    for d in range(1, n + 1):
        if d <= cap and n % d == 0:
            best = d
    return best


# ---------- Stage 1: DR conv + streamed covariance pooling + grouped row-conv ----------
def _gsop_cov_kernel(x_ref, w_dr_ref, b_dr_ref, w_row_ref, b_row_ref,
                     z_ref, g_ref, rsc_ref, rsr_ref, *, inv_m):
    m_idx = pl.program_id(1)
    bb = x_ref.shape[0]            # static
    tm = x_ref.shape[-1]           # static

    @pl.when(m_idx == 0)
    def _init():
        g_ref[...] = jnp.zeros_like(g_ref)
        rsc_ref[...] = jnp.zeros_like(rsc_ref)
        rsr_ref[...] = jnp.zeros_like(rsr_ref)

    ones_row = jnp.ones((1, tm), jnp.float32)   # hoisted out of the bb loop
    for i in range(bb):                          # static unroll, bb <= 8
        # relu_normal(x) (commutes with the host-side stride subsample)
        xs = jnp.maximum(x_ref[i], 0.0)                                          # (C, tm)
        # 1x1 DR conv + bias + relu
        y = jnp.dot(w_dr_ref[...], xs, preferred_element_type=jnp.float32)
        y = jnp.maximum(y + b_dr_ref[...], 0.0)                                  # (C, tm)
        # streamed second-order stats
        g_ref[i] += lax.dot_general(y, y, (((1,), (1,)), ((), ())),
                                    preferred_element_type=jnp.float32)          # (C, C)
        rsc_ref[i] += jnp.sum(y, axis=1, keepdims=True)                          # (C, 1)
        rsr_ref[i] += lax.dot_general(ones_row, y, (((1,), (1,)), ((), ())),
                                      preferred_element_type=jnp.float32)        # (1, C)

    @pl.when(m_idx == pl.num_programs(1) - 1)
    def _finish():
        for i in range(bb):
            # cov = (G - rs.rs^T / M) / M  ==  y @ I_hat @ y^T
            outer = rsc_ref[i] * rsr_ref[i]                                      # (C, C)
            cov = (g_ref[i] - outer * inv_m) * inv_m
            # row_conv_group: z[g, j] = sum_i W_row[4g+j, i] * cov[g, i] + b_row[4g+j]
            z = jnp.sum(w_row_ref[...] * cov[:, None, :], axis=-1) + b_row_ref[...]
            z_ref[i] = z.astype(z_ref.dtype)


# ---------- Stage 2: fc_adapt_channels, streamed over Cr tiles (no weight transpose) ---
def _gsop_fc_kernel(z_ref, w1_ref, w2_ref, s_ref, acc_ref):
    @pl.when(pl.program_id(0) == 0)
    def _init():
        acc_ref[...] = jnp.zeros_like(acc_ref)

    # h_tile = relu(Z @ W1^T[:, tile])  — contraction over C4, weights in native layout
    h = jnp.maximum(
        lax.dot_general(z_ref[...], w1_ref[...], (((1,), (1,)), ((), ())),
                        preferred_element_type=jnp.float32), 0.0)                # (B, tr)
    # acc += h_tile @ W2^T[tile, :]     — contraction over the Cr tile
    acc_ref[...] += lax.dot_general(h, w2_ref[...], (((1,), (1,)), ((), ())),
                                    preferred_element_type=jnp.float32)          # (B, C)

    @pl.when(pl.program_id(0) == pl.num_programs(0) - 1)
    def _finish():
        s_ref[...] = jax.nn.sigmoid(acc_ref[...]).astype(s_ref.dtype)


# ---------- Stage 3: per-channel rescale of x, spatially tiled --------------------------
def _gsop_scale_kernel(s_ref, x_ref, o_ref):
    o_ref[...] = s_ref[...] * x_ref[...]


# ----------------------------- wrapper --------------------------------------------------
def gsop_channel_attention(x, params):
    """x: (B, C, H, W) float32 (NCHW).  Returns (B, C, H, W)."""
    w_dr, b_dr, w_row, b_row, w_fc1, w_fc2 = params
    B, C, H, W = x.shape
    C4, Cr = 4 * C, 128 * C
    stride = 1 if C > 64 else 2
    vmem_limit = _vmem_limit_bytes()

    # 1x1 conv with stride == spatial subsample (layout glue, done once in XLA).
    x_sub4 = x if stride == 1 else x[:, :, ::stride, ::stride]
    Hs, Ws = x_sub4.shape[2], x_sub4.shape[3]
    M, Mf = Hs * Ws, H * W
    x_sub = x_sub4.reshape(B, C, M)

    w_row4 = w_row.reshape(C, 4, C)          # [g, j, i] == W_row[4g+j, i]
    b_row4 = b_row.reshape(C, 4)
    b_dr2 = b_dr.reshape(C, 1)

    # ---- Stage 1 ------------------------------------------------------------------
    budget1 = max(4 << 20, vmem_limit // 4)
    tm = _pick_tile(M, max(128, budget1 // (16 * C)))          # spatial reduction tile
    nm = M // tm
    per_b = 4 * (2 * C * tm + 8 * C * C) + 4096
    bb = _largest_divisor_leq(B, min(8, max(1, budget1 // per_b)))

    z = pl.pallas_call(
        functools.partial(_gsop_cov_kernel, inv_m=1.0 / M),
        out_shape=jax.ShapeDtypeStruct((B, C, 4), jnp.float32),
        grid=(B // bb, nm),
        in_specs=[
            pl.BlockSpec((bb, C, tm), lambda b, m: (b, 0, m)),   # x (subsampled)
            pl.BlockSpec((C, C), lambda b, m: (0, 0)),           # W_dr
            pl.BlockSpec((C, 1), lambda b, m: (0, 0)),           # b_dr
            pl.BlockSpec((C, 4, C), lambda b, m: (0, 0, 0)),     # W_row (grouped layout)
            pl.BlockSpec((C, 4), lambda b, m: (0, 0)),           # b_row
        ],
        out_specs=pl.BlockSpec((bb, C, 4), lambda b, m: (b, 0, 0)),
        scratch_shapes=[pltpu.VMEM((bb, C, C), jnp.float32),     # G accumulator
                        pltpu.VMEM((bb, C, 1), jnp.float32),     # row-sum (column layout)
                        pltpu.VMEM((bb, 1, C), jnp.float32)],    # row-sum (row layout)
        compiler_params=pltpu.CompilerParams(
            dimension_semantics=("parallel", "arbitrary"),
            vmem_limit_bytes=vmem_limit),
    )(x_sub, w_dr, b_dr2, w_row4, b_row4)

    z2 = z.reshape(B, C4)    # row-major (g, j) -> channel 4g+j (matches W_fc1 columns)

    # ---- Stage 2: s = sigmoid(relu(Z @ W1^T) @ W2^T), streamed over Cr ---------------
    budget2 = max(8 << 20, vmem_limit // 2)                      # double-buffered weights
    tr = _pick_tile(Cr, max(128, budget2 // (8 * (C4 + C))))
    # TODO(synk): optionally cast W_fc1/W_fc2 to bf16 (f32 accumulation) to halve the
    # weight-bandwidth-bound stage-2 read; kept f32 here to preserve tolerance margin.
    s = pl.pallas_call(
        _gsop_fc_kernel,
        out_shape=jax.ShapeDtypeStruct((B, C), jnp.float32),
        grid=(Cr // tr,),
        in_specs=[
            pl.BlockSpec((B, C4), lambda r: (0, 0)),             # Z (all batches, resident)
            pl.BlockSpec((tr, C4), lambda r: (r, 0)),            # W_fc1 tile (native layout)
            pl.BlockSpec((C, tr), lambda r: (0, r)),             # W_fc2 tile (native layout)
        ],
        out_specs=pl.BlockSpec((B, C), lambda r: (0, 0)),
        scratch_shapes=[pltpu.VMEM((B, C), jnp.float32)],
        compiler_params=pltpu.CompilerParams(
            dimension_semantics=("arbitrary",),
            vmem_limit_bytes=vmem_limit),
    )(z2, w_fc1, w_fc2)

    # ---- Stage 3: out = s * x, spatially tiled for the HBM roofline ------------------
    budget3 = max(4 << 20, vmem_limit // 6)
    tm3 = _pick_tile(Mf, min(8192, max(128, budget3 // (4 * C))))
    x_flat = x.reshape(B, C, Mf)
    s3 = s.reshape(B, C, 1).astype(x.dtype)
    out_flat = pl.pallas_call(
        _gsop_scale_kernel,
        out_shape=jax.ShapeDtypeStruct((B, C, Mf), x.dtype),
        grid=(B, Mf // tm3),
        in_specs=[
            pl.BlockSpec((None, C, 1), lambda b, m: (b, 0, 0)),     # s (reused across tiles)
            pl.BlockSpec((None, C, tm3), lambda b, m: (b, 0, m)),   # x tile
        ],
        out_specs=pl.BlockSpec((None, C, tm3), lambda b, m: (b, 0, m)),
        compiler_params=pltpu.CompilerParams(
            dimension_semantics=("parallel", "parallel"),
            vmem_limit_bytes=vmem_limit),
    )(s3, x_flat)

    return out_flat.reshape(B, C, H, W)


# ----------------------------- reference & test ----------------------------------------
def _reference(x, params):
    """Pure-JAX reference mirroring the PyTorch forward exactly."""
    w_dr, b_dr, w_row, b_row, w_fc1, w_fc2 = params
    B, C, H, W = x.shape
    stride = 1 if C > 64 else 2
    out = jnp.maximum(x, 0.0)
    out = out[:, :, ::stride, ::stride]                              # 1x1 conv stride
    out = jnp.einsum('oc,bchw->bohw', w_dr, out) + b_dr[None, :, None, None]
    out = jnp.maximum(out, 0.0)
    Hs, Ws = out.shape[2], out.shape[3]
    M = Hs * Ws
    xm = out.reshape(B, C, M)
    I_hat = (-1.0 / (M * M)) * jnp.ones((M, M), x.dtype) + (1.0 / M) * jnp.eye(M, dtype=x.dtype)
    cov = jnp.einsum('bcm,mn,bdn->bcd', xm, I_hat, xm)               # (B, C, C)
    cov_rep = jnp.repeat(cov, 4, axis=1)                             # (B, 4C, C)
    z = jnp.sum(w_row[None] * cov_rep, axis=-1) + b_row[None]        # (B, 4C)
    h = jnp.maximum(z @ w_fc1.T, 0.0)                                # (B, 128C)
    s = jax.nn.sigmoid(h @ w_fc2.T)                                  # (B, C)
    return s[:, :, None, None] * x


def make_params(key, C):
    C4, Cr = 4 * C, 128 * C
    ks = jax.random.split(key, 6)
    w_dr = 0.2 * jax.random.normal(ks[0], (C, C), jnp.float32)
    b_dr = 0.1 * jax.random.normal(ks[1], (C,), jnp.float32)
    w_row = 0.2 * jax.random.normal(ks[2], (C4, C), jnp.float32)
    b_row = 0.1 * jax.random.normal(ks[3], (C4,), jnp.float32)
    w_fc1 = 0.1 * jax.random.normal(ks[4], (Cr, C4), jnp.float32)
    w_fc2 = 0.1 * jax.random.normal(ks[5], (C, Cr), jnp.float32)
    return (w_dr, b_dr, w_row, b_row, w_fc1, w_fc2)


if __name__ == "__main__":
    B, C, H, W = 2, 4, 16, 16   # in_chn=4 <= 64  ->  DR_stride = 2
    key = jax.random.PRNGKey(0)
    kx, kp = jax.random.split(key)
    x = jax.random.normal(kx, (B, C, H, W), jnp.float32)
    params = make_params(kp, C)

    gsop = jax.jit(gsop_channel_attention)
    out = jax.block_until_ready(gsop(x, params))
    ref = jax.block_until_ready(_reference(x, params))

    assert out.shape == (B, C, H, W)
    assert jnp.allclose(out, ref, atol=1e-3, rtol=1e-3), "mismatch vs reference"
    print("KERNEL_OK")
</pallas_src>

<mosaic_0001>
module attributes {stable_mosaic.version = 11 : i64} {
  func.func @_gsop_fc_kernel(%arg0: i32, %arg1: memref<2x16xf32, #tpu.memory_space<vmem>>, %arg2: memref<512x16xf32, #tpu.memory_space<vmem>>, %arg3: memref<4x512xf32, #tpu.memory_space<vmem>>, %arg4: memref<2x4xf32, #tpu.memory_space<vmem>>, %arg5: memref<2x4xf32, #tpu.memory_space<vmem>>) attributes {dimension_semantics = [#tpu.dimension_semantics<arbitrary>], iteration_bounds = array<i64: 1>, scalar_prefetch = 0 : i64, scratch_operands = 1 : i64, tpu.core_type = #tpu.core_type<tc>, window_params = [{pipeline_mode = #tpu.pipeline_mode<synchronous>, transform_indices = @transform_0, window_bounds = array<i64: 2, 16>}, {transform_indices = @transform_1, window_bounds = array<i64: 512, 16>}, {transform_indices = @transform_2, window_bounds = array<i64: 4, 512>}, {pipeline_mode = #tpu.pipeline_mode<synchronous>, transform_indices = @transform_3, window_bounds = array<i64: 2, 4>}]} {
    %c0_i32 = arith.constant 0 : i32
    %0 = arith.cmpi eq, %arg0, %c0_i32 : i32
    %1 = arith.extui %0 : i1 to i32
    %c0_i32_0 = arith.constant 0 : i32
    %2 = arith.cmpi ne, %1, %c0_i32_0 : i32
    scf.if %2 {
      %cst_14 = arith.constant 0.000000e+00 : f32
      %16 = vector.broadcast %cst_14 : f32 to vector<2x4xf32>
      %c0_15 = arith.constant 0 : index
      %c0_16 = arith.constant 0 : index
      %17 = vector.load %arg5[%c0_15, %c0_16] : memref<2x4xf32, #tpu.memory_space<vmem>>, vector<2x4xf32>
      tpu.vector_store %arg5[%c0_15, %c0_16], %16 {strides = array<i32>} : memref<2x4xf32, #tpu.memory_space<vmem>>, vector<2x4xf32>,
    } else {
    }
    %c0 = arith.constant 0 : index
    %c0_1 = arith.constant 0 : index
    %3 = vector.load %arg1[%c0, %c0_1] : memref<2x16xf32, #tpu.memory_space<vmem>>, vector<2x16xf32>
    %c0_2 = arith.constant 0 : index
    %c0_3 = arith.constant 0 : index
    %4 = vector.load %arg2[%c0_2, %c0_3] : memref<512x16xf32, #tpu.memory_space<vmem>>, vector<512x16xf32>
    %cst = arith.constant dense<0.000000e+00> : vector<2x512xf32>
    %5 = tpu.matmul %3, %4, %cst {dimension_numbers = #tpu.dot_dimension_numbers<[1], [1], [0], [0], [0, 0, 1, 0], [], []>} : vector<2x16xf32>, vector<512x16xf32>, vector<2x512xf32> -> vector<2x512xf32>
    %cst_4 = arith.constant 0.000000e+00 : f32
    %6 = vector.broadcast %cst_4 : f32 to vector<2x512xf32>
    %7 = arith.maximumf %5, %6 : vector<2x512xf32>
    %c0_5 = arith.constant 0 : index
    %c0_6 = arith.constant 0 : index
    %8 = vector.load %arg5[%c0_5, %c0_6] : memref<2x4xf32, #tpu.memory_space<vmem>>, vector<2x4xf32>
    %c0_7 = arith.constant 0 : index
    %c0_8 = arith.constant 0 : index
    %9 = vector.load %arg3[%c0_7, %c0_8] : memref<4x512xf32, #tpu.memory_space<vmem>>, vector<4x512xf32>
    %cst_9 = arith.constant dense<0.000000e+00> : vector<2x4xf32>
    %10 = tpu.matmul %7, %9, %cst_9 {dimension_numbers = #tpu.dot_dimension_numbers<[1], [1], [0], [0], [0, 0, 1, 0], [], []>} : vector<2x512xf32>, vector<4x512xf32>, vector<2x4xf32> -> vector<2x4xf32>
    %11 = arith.addf %8, %10 : vector<2x4xf32>
    %c0_10 = arith.constant 0 : index
    %c0_11 = arith.constant 0 : index
    %12 = vector.load %arg5[%c0_10, %c0_11] : memref<2x4xf32, #tpu.memory_space<vmem>>, vector<2x4xf32>
    tpu.vector_store %arg5[%c0_10, %c0_11], %11 {strides = array<i32>} : memref<2x4xf32, #tpu.memory_space<vmem>>, vector<2x4xf32>,
    %c0_i32_12 = arith.constant 0 : i32
    %13 = arith.cmpi eq, %arg0, %c0_i32_12 : i32
    %14 = arith.extui %13 : i1 to i32
    %c0_i32_13 = arith.constant 0 : i32
    %15 = arith.cmpi ne, %14, %c0_i32_13 : i32
    scf.if %15 {
      %c0_14 = arith.constant 0 : index
      %c0_15 = arith.constant 0 : index
      %16 = vector.load %arg5[%c0_14, %c0_15] : memref<2x4xf32, #tpu.memory_space<vmem>>, vector<2x4xf32>
      %17 = arith.negf %16 : vector<2x4xf32>
      %18 = math.exp %17 : vector<2x4xf32>
      %cst_16 = arith.constant 1.000000e+00 : f32
      %19 = vector.broadcast %cst_16 : f32 to vector<2x4xf32>
      %20 = arith.addf %19, %18 : vector<2x4xf32>
      %21 = arith.divf %19, %20 : vector<2x4xf32>
      %c0_17 = arith.constant 0 : index
      %c0_18 = arith.constant 0 : index
      %22 = vector.load %arg4[%c0_17, %c0_18] : memref<2x4xf32, #tpu.memory_space<vmem>>, vector<2x4xf32>
      tpu.vector_store %arg4[%c0_17, %c0_18], %21 {strides = array<i32>} : memref<2x4xf32, #tpu.memory_space<vmem>>, vector<2x4xf32>,
    } else {
    }
    return
  }
  func.func @transform_0(%arg0: i32) -> (i32, i32) {
    %c0_i32 = arith.constant 0 : i32
    %c0_i32_0 = arith.constant 0 : i32
    %c0_i32_1 = arith.constant 0 : i32
    return %c0_i32, %c0_i32_0 : i32, i32
  }
  func.func @transform_1(%arg0: i32) -> (i32, i32) {
    %c0_i32 = arith.constant 0 : i32
    %c0_i32_0 = arith.constant 0 : i32
    return %arg0, %c0_i32 : i32, i32
  }
  func.func @transform_2(%arg0: i32) -> (i32, i32) {
    %c0_i32 = arith.constant 0 : i32
    %c0_i32_0 = arith.constant 0 : i32
    return %c0_i32, %arg0 : i32, i32
  }
  func.func @transform_3(%arg0: i32) -> (i32, i32) {
    %c0_i32 = arith.constant 0 : i32
    %c0_i32_0 = arith.constant 0 : i32
    %c0_i32_1 = arith.constant 0 : i32
    return %c0_i32, %c0_i32_0 : i32, i32
  }
}

module attributes {stable_mosaic.version = 11 : i64} {
  func.func @_gsop_cov_kernel(%arg0: i32, %arg1: i32, %arg2: memref<2x4x64xf32, #tpu.memory_space<vmem>>, %arg3: memref<4x4xf32, #tpu.memory_space<vmem>>, %arg4: memref<4x1xf32, #tpu.memory_space<vmem>>, %arg5: memref<4x4x4xf32, #tpu.memory_space<vmem>>, %arg6: memref<4x4xf32, #tpu.memory_space<vmem>>, %arg7: memref<2x4x4xf32, #tpu.memory_space<vmem>>, %arg8: memref<2x4x4xf32, #tpu.memory_space<vmem>>, %arg9: memref<2x4x1xf32, #tpu.memory_space<vmem>>, %arg10: memref<2x1x4xf32, #tpu.memory_space<vmem>>) attributes {dimension_semantics = [#tpu.dimension_semantics<parallel>, #tpu.dimension_semantics<arbitrary>], iteration_bounds = array<i64: 1, 1>, scalar_prefetch = 0 : i64, scratch_operands = 3 : i64, tpu.core_type = #tpu.core_type<tc>, window_params = [{transform_indices = @transform_0, window_bounds = array<i64: 2, 4, 64>}, {pipeline_mode = #tpu.pipeline_mode<synchronous>, transform_indices = @transform_1, window_bounds = array<i64: 4, 4>}, {pipeline_mode = #tpu.pipeline_mode<synchronous>, transform_indices = @transform_2, window_bounds = array<i64: 4, 1>}, {pipeline_mode = #tpu.pipeline_mode<synchronous>, transform_indices = @transform_3, window_bounds = array<i64: 4, 4, 4>}, {pipeline_mode = #tpu.pipeline_mode<synchronous>, transform_indices = @transform_4, window_bounds = array<i64: 4, 4>}, {transform_indices = @transform_5, window_bounds = array<i64: 2, 4, 4>}]} {
    %c0_i32 = arith.constant 0 : i32
    %0 = arith.cmpi eq, %arg1, %c0_i32 : i32
    %1 = arith.extui %0 : i1 to i32
    %c0_i32_0 = arith.constant 0 : i32
    %2 = arith.cmpi ne, %1, %c0_i32_0 : i32
    scf.if %2 {
      %cst_63 = arith.constant 0.000000e+00 : f32
      %73 = vector.broadcast %cst_63 : f32 to vector<2x4x4xf32>
      %c0_64 = arith.constant 0 : index
      %c0_65 = arith.constant 0 : index
      %c0_66 = arith.constant 0 : index
      %74 = vector.load %arg8[%c0_64, %c0_65, %c0_66] : memref<2x4x4xf32, #tpu.memory_space<vmem>>, vector<2x4x4xf32>
      tpu.vector_store %arg8[%c0_64, %c0_65, %c0_66], %73 {strides = array<i32>} : memref<2x4x4xf32, #tpu.memory_space<vmem>>, vector<2x4x4xf32>,
      %cst_67 = arith.constant 0.000000e+00 : f32
      %75 = vector.broadcast %cst_67 : f32 to vector<2x4x1xf32>
      %c0_68 = arith.constant 0 : index
      %c0_69 = arith.constant 0 : index
      %c0_70 = arith.constant 0 : index
      %76 = vector.load %arg9[%c0_68, %c0_69, %c0_70] : memref<2x4x1xf32, #tpu.memory_space<vmem>>, vector<2x4x1xf32>
      tpu.vector_store %arg9[%c0_68, %c0_69, %c0_70], %75 {strides = array<i32>} : memref<2x4x1xf32, #tpu.memory_space<vmem>>, vector<2x4x1xf32>,
      %cst_71 = arith.constant 0.000000e+00 : f32
      %77 = vector.broadcast %cst_71 : f32 to vector<2x1x4xf32>
      %c0_72 = arith.constant 0 : index
      %c0_73 = arith.constant 0 : index
      %c0_74 = arith.constant 0 : index
      %78 = vector.load %arg10[%c0_72, %c0_73, %c0_74] : memref<2x1x4xf32, #tpu.memory_space<vmem>>, vector<2x1x4xf32>
      tpu.vector_store %arg10[%c0_72, %c0_73, %c0_74], %77 {strides = array<i32>} : memref<2x1x4xf32, #tpu.memory_space<vmem>>, vector<2x1x4xf32>,
    } else {
    }
    %cst = arith.constant 1.000000e+00 : f32
    %3 = vector.broadcast %cst : f32 to vector<1x64xf32>
    %c0 = arith.constant 0 : index
    %c0_1 = arith.constant 0 : index
    %c0_2 = arith.constant 0 : index
    %4 = vector.load %arg2[%c0, %c0_1, %c0_2] : memref<2x4x64xf32, #tpu.memory_space<vmem>>, vector<1x4x64xf32>
    %5 = vector.shape_cast %4 : vector<1x4x64xf32> to vector<4x64xf32>
    %cst_3 = arith.constant 0.000000e+00 : f32
    %6 = vector.broadcast %cst_3 : f32 to vector<4x64xf32>
    %7 = arith.maximumf %5, %6 : vector<4x64xf32>
    %c0_4 = arith.constant 0 : index
    %c0_5 = arith.constant 0 : index
    %8 = vector.load %arg3[%c0_4, %c0_5] : memref<4x4xf32, #tpu.memory_space<vmem>>, vector<4x4xf32>
    %cst_6 = arith.constant dense<0.000000e+00> : vector<4x64xf32>
    %9 = tpu.matmul %8, %7, %cst_6 {dimension_numbers = #tpu.dot_dimension_numbers<[1], [0], [0], [1], [0, 0, 1, 1], [], []>} : vector<4x4xf32>, vector<4x64xf32>, vector<4x64xf32> -> vector<4x64xf32>
    %c0_7 = arith.constant 0 : index
    %c0_8 = arith.constant 0 : index
    %10 = vector.load %arg4[%c0_7, %c0_8] : memref<4x1xf32, #tpu.memory_space<vmem>>, vector<4x1xf32>
    %11 = vector.broadcast %10 : vector<4x1xf32> to vector<4x64xf32>
    %12 = arith.addf %9, %11 : vector<4x64xf32>
    %cst_9 = arith.constant 0.000000e+00 : f32
    %13 = vector.broadcast %cst_9 : f32 to vector<4x64xf32>
    %14 = arith.maximumf %12, %13 : vector<4x64xf32>
    %c0_10 = arith.constant 0 : index
    %c0_11 = arith.constant 0 : index
    %c0_12 = arith.constant 0 : index
    %15 = vector.load %arg8[%c0_10, %c0_11, %c0_12] : memref<2x4x4xf32, #tpu.memory_space<vmem>>, vector<1x4x4xf32>
    %16 = vector.shape_cast %15 : vector<1x4x4xf32> to vector<4x4xf32>
    %cst_13 = arith.constant dense<0.000000e+00> : vector<4x4xf32>
    %17 = tpu.matmul %14, %14, %cst_13 {dimension_numbers = #tpu.dot_dimension_numbers<[1], [1], [0], [0], [0, 0, 1, 0], [], []>} : vector<4x64xf32>, vector<4x64xf32>, vector<4x4xf32> -> vector<4x4xf32>
    %18 = arith.addf %16, %17 : vector<4x4xf32>
    %c0_14 = arith.constant 0 : index
    %c0_15 = arith.constant 0 : index
    %c0_16 = arith.constant 0 : index
    %19 = vector.load %arg8[%c0_14, %c0_15, %c0_16] : memref<2x4x4xf32, #tpu.memory_space<vmem>>, vector<1x4x4xf32>
    %20 = vector.shape_cast %19 : vector<1x4x4xf32> to vector<4x4xf32>
    %21 = vector.shape_cast %18 : vector<4x4xf32> to vector<1x4x4xf32>
    tpu.vector_store %arg8[%c0_14, %c0_15, %c0_16], %21 {strides = array<i32>} : memref<2x4x4xf32, #tpu.memory_space<vmem>>, vector<1x4x4xf32>,
    %c0_17 = arith.constant 0 : index
    %c0_18 = arith.constant 0 : index
    %c0_19 = arith.constant 0 : index
    %22 = vector.load %arg9[%c0_17, %c0_18, %c0_19] : memref<2x4x1xf32, #tpu.memory_space<vmem>>, vector<1x4x1xf32>
    %23 = vector.shape_cast %22 : vector<1x4x1xf32> to vector<4x1xf32>
    %cst_20 = arith.constant dense<0.000000e+00> : vector<4xf32>
    %24 = vector.multi_reduction <add>, %14, %cst_20 [1] : vector<4x64xf32> to vector<4xf32>
    %25 = vector.shape_cast %24 : vector<4xf32> to vector<4x1xf32>
    %26 = arith.addf %23, %25 : vector<4x1xf32>
    %c0_21 = arith.constant 0 : index
    %c0_22 = arith.constant 0 : index
    %c0_23 = arith.constant 0 : index
    %27 = vector.load %arg9[%c0_21, %c0_22, %c0_23] : memref<2x4x1xf32, #tpu.memory_space<vmem>>, vector<1x4x1xf32>
    %28 = vector.shape_cast %27 : vector<1x4x1xf32> to vector<4x1xf32>
    %29 = vector.shape_cast %26 : vector<4x1xf32> to vector<1x4x1xf32>
    tpu.vector_store %arg9[%c0_21, %c0_22, %c0_23], %29 {strides = array<i32>} : memref<2x4x1xf32, #tpu.memory_space<vmem>>, vector<1x4x1xf32>,
    %c0_24 = arith.constant 0 : index
    %c0_25 = arith.constant 0 : index
    %c0_26 = arith.constant 0 : index
    %30 = vector.load %arg10[%c0_24, %c0_25, %c0_26] : memref<2x1x4xf32, #tpu.memory_space<vmem>>, vector<1x1x4xf32>
    %31 = vector.shape_cast %30 : vector<1x1x4xf32> to vector<1x4xf32>
    %cst_27 = arith.constant dense<0.000000e+00> : vector<1x4xf32>
    %32 = tpu.matmul %3, %14, %cst_27 {dimension_numbers = #tpu.dot_dimension_numbers<[1], [1], [0], [0], [0, 0, 1, 0], [], []>} : vector<1x64xf32>, vector<4x64xf32>, vector<1x4xf32> -> vector<1x4xf32>
    %33 = arith.addf %31, %32 : vector<1x4xf32>
    %c0_28 = arith.constant 0 : index
    %c0_29 = arith.constant 0 : index
    %c0_30 = arith.constant 0 : index
    %34 = vector.load %arg10[%c0_28, %c0_29, %c0_30] : memref<2x1x4xf32, #tpu.memory_space<vmem>>, vector<1x1x4xf32>
    %35 = vector.shape_cast %34 : vector<1x1x4xf32> to vector<1x4xf32>
    %36 = vector.shape_cast %33 : vector<1x4xf32> to vector<1x1x4xf32>
    tpu.vector_store %arg10[%c0_28, %c0_29, %c0_30], %36 {strides = array<i32>} : memref<2x1x4xf32, #tpu.memory_space<vmem>>, vector<1x1x4xf32>,
    %c1 = arith.constant 1 : index
    %c0_31 = arith.constant 0 : index
    %c0_32 = arith.constant 0 : index
    %37 = vector.load %arg2[%c1, %c0_31, %c0_32] : memref<2x4x64xf32, #tpu.memory_space<vmem>>, vector<1x4x64xf32>
    %38 = vector.shape_cast %37 : vector<1x4x64xf32> to vector<4x64xf32>
    %cst_33 = arith.constant 0.000000e+00 : f32
    %39 = vector.broadcast %cst_33 : f32 to vector<4x64xf32>
    %40 = arith.maximumf %38, %39 : vector<4x64xf32>
    %c0_34 = arith.constant 0 : index
    %c0_35 = arith.constant 0 : index
    %41 = vector.load %arg3[%c0_34, %c0_35] : memref<4x4xf32, #tpu.memory_space<vmem>>, vector<4x4xf32>
    %cst_36 = arith.constant dense<0.000000e+00> : vector<4x64xf32>
    %42 = tpu.matmul %41, %40, %cst_36 {dimension_numbers = #tpu.dot_dimension_numbers<[1], [0], [0], [1], [0, 0, 1, 1], [], []>} : vector<4x4xf32>, vector<4x64xf32>, vector<4x64xf32> -> vector<4x64xf32>
    %c0_37 = arith.constant 0 : index
    %c0_38 = arith.constant 0 : index
    %43 = vector.load %arg4[%c0_37, %c0_38] : memref<4x1xf32, #tpu.memory_space<vmem>>, vector<4x1xf32>
    %44 = vector.broadcast %43 : vector<4x1xf32> to vector<4x64xf32>
    %45 = arith.addf %42, %44 : vector<4x64xf32>
    %cst_39 = arith.constant 0.000000e+00 : f32
    %46 = vector.broadcast %cst_39 : f32 to vector<4x64xf32>
    %47 = arith.maximumf %45, %46 : vector<4x64xf32>
    %c1_40 = arith.constant 1 : index
    %c0_41 = arith.constant 0 : index
    %c0_42 = arith.constant 0 : index
    %48 = vector.load %arg8[%c1_40, %c0_41, %c0_42] : memref<2x4x4xf32, #tpu.memory_space<vmem>>, vector<1x4x4xf32>
    %49 = vector.shape_cast %48 : vector<1x4x4xf32> to vector<4x4xf32>
    %cst_43 = arith.constant dense<0.000000e+00> : vector<4x4xf32>
    %50 = tpu.matmul %47, %47, %cst_43 {dimension_numbers = #tpu.dot_dimension_numbers<[1], [1], [0], [0], [0, 0, 1, 0], [], []>} : vector<4x64xf32>, vector<4x64xf32>, vector<4x4xf32> -> vector<4x4xf32>
    %51 = arith.addf %49, %50 : vector<4x4xf32>
    %c1_44 = arith.constant 1 : index
    %c0_45 = arith.constant 0 : index
    %c0_46 = arith.constant 0 : index
    %52 = vector.load %arg8[%c1_44, %c0_45, %c0_46] : memref<2x4x4xf32, #tpu.memory_space<vmem>>, vector<1x4x4xf32>
    %53 = vector.shape_cast %52 : vector<1x4x4xf32> to vector<4x4xf32>
    %54 = vector.shape_cast %51 : vector<4x4xf32> to vector<1x4x4xf32>
    tpu.vector_store %arg8[%c1_44, %c0_45, %c0_46], %54 {strides = array<i32>} : memref<2x4x4xf32, #tpu.memory_space<vmem>>, vector<1x4x4xf32>,
    %c1_47 = arith.constant 1 : index
    %c0_48 = arith.constant 0 : index
    %c0_49 = arith.constant 0 : index
    %55 = vector.load %arg9[%c1_47, %c0_48, %c0_49] : memref<2x4x1xf32, #tpu.memory_space<vmem>>, vector<1x4x1xf32>
    %56 = vector.shape_cast %55 : vector<1x4x1xf32> to vector<4x1xf32>
    %cst_50 = arith.constant dense<0.000000e+00> : vector<4xf32>
    %57 = vector.multi_reduction <add>, %47, %cst_50 [1] : vector<4x64xf32> to vector<4xf32>
    %58 = vector.shape_cast %57 : vector<4xf32> to vector<4x1xf32>
    %59 = arith.addf %56, %58 : vector<4x1xf32>
    %c1_51 = arith.constant 1 : index
    %c0_52 = arith.constant 0 : index
    %c0_53 = arith.constant 0 : index
    %60 = vector.load %arg9[%c1_51, %c0_52, %c0_53] : memref<2x4x1xf32, #tpu.memory_space<vmem>>, vector<1x4x1xf32>
    %61 = vector.shape_cast %60 : vector<1x4x1xf32> to vector<4x1xf32>
    %62 = vector.shape_cast %59 : vector<4x1xf32> to vector<1x4x1xf32>
    tpu.vector_store %arg9[%c1_51, %c0_52, %c0_53], %62 {strides = array<i32>} : memref<2x4x1xf32, #tpu.memory_space<vmem>>, vector<1x4x1xf32>,
    %c1_54 = arith.constant 1 : index
    %c0_55 = arith.constant 0 : index
    %c0_56 = arith.constant 0 : index
    %63 = vector.load %arg10[%c1_54, %c0_55, %c0_56] : memref<2x1x4xf32, #tpu.memory_space<vmem>>, vector<1x1x4xf32>
    %64 = vector.shape_cast %63 : vector<1x1x4xf32> to vector<1x4xf32>
    %cst_57 = arith.constant dense<0.000000e+00> : vector<1x4xf32>
    %65 = tpu.matmul %3, %47, %cst_57 {dimension_numbers = #tpu.dot_dimension_numbers<[1], [1], [0], [0], [0, 0, 1, 0], [], []>} : vector<1x64xf32>, vector<4x64xf32>, vector<1x4xf32> -> vector<1x4xf32>
    %66 = arith.addf %64, %65 : vector<1x4xf32>
    %c1_58 = arith.constant 1 : index
    %c0_59 = arith.constant 0 : index
    %c0_60 = arith.constant 0 : index
    %67 = vector.load %arg10[%c1_58, %c0_59, %c0_60] : memref<2x1x4xf32, #tpu.memory_space<vmem>>, vector<1x1x4xf32>
    %68 = vector.shape_cast %67 : vector<1x1x4xf32> to vector<1x4xf32>
    %69 = vector.shape_cast %66 : vector<1x4xf32> to vector<1x1x4xf32>
    tpu.vector_store %arg10[%c1_58, %c0_59, %c0_60], %69 {strides = array<i32>} : memref<2x1x4xf32, #tpu.memory_space<vmem>>, vector<1x1x4xf32>,
    %c0_i32_61 = arith.constant 0 : i32
    %70 = arith.cmpi eq, %arg1, %c0_i32_61 : i32
    %71 = arith.extui %70 : i1 to i32
    %c0_i32_62 = arith.constant 0 : i32
    %72 = arith.cmpi ne, %71, %c0_i32_62 : i32
    scf.if %72 {
      %c0_63 = arith.constant 0 : index
      %c0_64 = arith.constant 0 : index
      %c0_65 = arith.constant 0 : index
      %73 = vector.load %arg9[%c0_63, %c0_64, %c0_65] : memref<2x4x1xf32, #tpu.memory_space<vmem>>, vector<1x4x1xf32>
      %74 = vector.shape_cast %73 : vector<1x4x1xf32> to vector<4x1xf32>
      %c0_66 = arith.constant 0 : index
      %c0_67 = arith.constant 0 : index
      %c0_68 = arith.constant 0 : index
      %75 = vector.load %arg10[%c0_66, %c0_67, %c0_68] : memref<2x1x4xf32, #tpu.memory_space<vmem>>, vector<1x1x4xf32>
      %76 = vector.shape_cast %75 : vector<1x1x4xf32> to vector<1x4xf32>
      %77 = vector.broadcast %74 : vector<4x1xf32> to vector<4x4xf32>
      %78 = vector.broadcast %76 : vector<1x4xf32> to vector<4x4xf32>
      %79 = arith.mulf %77, %78 : vector<4x4xf32>
      %c0_69 = arith.constant 0 : index
      %c0_70 = arith.constant 0 : index
      %c0_71 = arith.constant 0 : index
      %80 = vector.load %arg8[%c0_69, %c0_70, %c0_71] : memref<2x4x4xf32, #tpu.memory_space<vmem>>, vector<1x4x4xf32>
      %81 = vector.shape_cast %80 : vector<1x4x4xf32> to vector<4x4xf32>
      %cst_72 = arith.constant 1.562500e-02 : f32
      %82 = vector.broadcast %cst_72 : f32 to vector<4x4xf32>
      %83 = arith.mulf %79, %82 : vector<4x4xf32>
      %84 = arith.subf %81, %83 : vector<4x4xf32>
      %cst_73 = arith.constant 1.562500e-02 : f32
      %85 = vector.broadcast %cst_73 : f32 to vector<4x4xf32>
      %86 = arith.mulf %84, %85 : vector<4x4xf32>
      %c0_74 = arith.constant 0 : index
      %c0_75 = arith.constant 0 : index
      %c0_76 = arith.constant 0 : index
      %87 = vector.load %arg5[%c0_74, %c0_75, %c0_76] : memref<4x4x4xf32, #tpu.memory_space<vmem>>, vector<4x4x4xf32>
      %88 = vector.shape_cast %86 : vector<4x4xf32> to vector<4x1x4xf32>
      %89 = vector.broadcast %88 : vector<4x1x4xf32> to vector<4x4x4xf32>
      %90 = arith.mulf %87, %89 : vector<4x4x4xf32>
      %cst_77 = arith.constant dense<0.000000e+00> : vector<4x4xf32>
      %91 = vector.multi_reduction <add>, %90, %cst_77 [2] : vector<4x4x4xf32> to vector<4x4xf32>
      %c0_78 = arith.constant 0 : index
      %c0_79 = arith.constant 0 : index
      %92 = vector.load %arg6[%c0_78, %c0_79] : memref<4x4xf32, #tpu.memory_space<vmem>>, vector<4x4xf32>
      %93 = arith.addf %91, %92 : vector<4x4xf32>
      %c0_80 = arith.constant 0 : index
      %c0_81 = arith.constant 0 : index
      %c0_82 = arith.constant 0 : index
      %94 = vector.load %arg7[%c0_80, %c0_81, %c0_82] : memref<2x4x4xf32, #tpu.memory_space<vmem>>, vector<1x4x4xf32>
      %95 = vector.shape_cast %94 : vector<1x4x4xf32> to vector<4x4xf32>
      %96 = vector.shape_cast %93 : vector<4x4xf32> to vector<1x4x4xf32>
      tpu.vector_store %arg7[%c0_80, %c0_81, %c0_82], %96 {strides = array<i32>} : memref<2x4x4xf32, #tpu.memory_space<vmem>>, vector<1x4x4xf32>,
      %c1_83 = arith.constant 1 : index
      %c0_84 = arith.constant 0 : index
      %c0_85 = arith.constant 0 : index
      %97 = vector.load %arg9[%c1_83, %c0_84, %c0_85] : memref<2x4x1xf32, #tpu.memory_space<vmem>>, vector<1x4x1xf32>
      %98 = vector.shape_cast %97 : vector<1x4x1xf32> to vector<4x1xf32>
      %c1_86 = arith.constant 1 : index
      %c0_87 = arith.constant 0 : index
      %c0_88 = arith.constant 0 : index
      %99 = vector.load %arg10[%c1_86, %c0_87, %c0_88] : memref<2x1x4xf32, #tpu.memory_space<vmem>>, vector<1x1x4xf32>
      %100 = vector.shape_cast %99 : vector<1x1x4xf32> to vector<1x4xf32>
      %101 = vector.broadcast %98 : vector<4x1xf32> to vector<4x4xf32>
      %102 = vector.broadcast %100 : vector<1x4xf32> to vector<4x4xf32>
      %103 = arith.mulf %101, %102 : vector<4x4xf32>
      %c1_89 = arith.constant 1 : index
      %c0_90 = arith.constant 0 : index
      %c0_91 = arith.constant 0 : index
      %104 = vector.load %arg8[%c1_89, %c0_90, %c0_91] : memref<2x4x4xf32, #tpu.memory_space<vmem>>, vector<1x4x4xf32>
      %105 = vector.shape_cast %104 : vector<1x4x4xf32> to vector<4x4xf32>
      %cst_92 = arith.constant 1.562500e-02 : f32
      %106 = vector.broadcast %cst_92 : f32 to vector<4x4xf32>
      %107 = arith.mulf %103, %106 : vector<4x4xf32>
      %108 = arith.subf %105, %107 : vector<4x4xf32>
      %cst_93 = arith.constant 1.562500e-02 : f32
      %109 = vector.broadcast %cst_93 : f32 to vector<4x4xf32>
      %110 = arith.mulf %108, %109 : vector<4x4xf32>
      %c0_94 = arith.constant 0 : index
      %c0_95 = arith.constant 0 : index
      %c0_96 = arith.constant 0 : index
      %111 = vector.load %arg5[%c0_94, %c0_95, %c0_96] : memref<4x4x4xf32, #tpu.memory_space<vmem>>, vector<4x4x4xf32>
      %112 = vector.shape_cast %110 : vector<4x4xf32> to vector<4x1x4xf32>
      %113 = vector.broadcast %112 : vector<4x1x4xf32> to vector<4x4x4xf32>
      %114 = arith.mulf %111, %113 : vector<4x4x4xf32>
      %cst_97 = arith.constant dense<0.000000e+00> : vector<4x4xf32>
      %115 = vector.multi_reduction <add>, %114, %cst_97 [2] : vector<4x4x4xf32> to vector<4x4xf32>
      %c0_98 = arith.constant 0 : index
      %c0_99 = arith.constant 0 : index
      %116 = vector.load %arg6[%c0_98, %c0_99] : memref<4x4xf32, #tpu.memory_space<vmem>>, vector<4x4xf32>
      %117 = arith.addf %115, %116 : vector<4x4xf32>
      %c1_100 = arith.constant 1 : index
      %c0_101 = arith.constant 0 : index
      %c0_102 = arith.constant 0 : index
      %118 = vector.load %arg7[%c1_100, %c0_101, %c0_102] : memref<2x4x4xf32, #tpu.memory_space<vmem>>, vector<1x4x4xf32>
      %119 = vector.shape_cast %118 : vector<1x4x4xf32> to vector<4x4xf32>
      %120 = vector.shape_cast %117 : vector<4x4xf32> to vector<1x4x4xf32>
      tpu.vector_store %arg7[%c1_100, %c0_101, %c0_102], %120 {strides = array<i32>} : memref<2x4x4xf32, #tpu.memory_space<vmem>>, vector<1x4x4xf32>,
    } else {
    }
    return
  }
  func.func @transform_0(%arg0: i32, %arg1: i32) -> (i32, i32, i32) {
    %c0_i32 = arith.constant 0 : i32
    %c0_i32_0 = arith.constant 0 : i32
    return %arg0, %c0_i32, %arg1 : i32, i32, i32
  }
  func.func @transform_1(%arg0: i32, %arg1: i32) -> (i32, i32) {
    %c0_i32 = arith.constant 0 : i32
    %c0_i32_0 = arith.constant 0 : i32
    %c0_i32_1 = arith.constant 0 : i32
    return %c0_i32, %c0_i32_0 : i32, i32
  }
  func.func @transform_2(%arg0: i32, %arg1: i32) -> (i32, i32) {
    %c0_i32 = arith.constant 0 : i32
    %c0_i32_0 = arith.constant 0 : i32
    %c0_i32_1 = arith.constant 0 : i32
    return %c0_i32, %c0_i32_0 : i32, i32
  }
  func.func @transform_3(%arg0: i32, %arg1: i32) -> (i32, i32, i32) {
    %c0_i32 = arith.constant 0 : i32
    %c0_i32_0 = arith.constant 0 : i32
    %c0_i32_1 = arith.constant 0 : i32
    %c0_i32_2 = arith.constant 0 : i32
    return %c0_i32, %c0_i32_0, %c0_i32_1 : i32, i32, i32
  }
  func.func @transform_4(%arg0: i32, %arg1: i32) -> (i32, i32) {
    %c0_i32 = arith.constant 0 : i32
    %c0_i32_0 = arith.constant 0 : i32
    %c0_i32_1 = arith.constant 0 : i32
    return %c0_i32, %c0_i32_0 : i32, i32
  }
  func.func @transform_5(%arg0: i32, %arg1: i32) -> (i32, i32, i32) {
    %c0_i32 = arith.constant 0 : i32
    %c0_i32_0 = arith.constant 0 : i32
    %c0_i32_1 = arith.constant 0 : i32
    return %arg0, %c0_i32, %c0_i32_0 : i32, i32, i32
  }
}

module attributes {stable_mosaic.version = 11 : i64} {
  func.func @_gsop_scale_kernel(%arg0: i32, %arg1: i32, %arg2: memref<1x4x1xf32, #tpu.memory_space<vmem>>, %arg3: memref<1x4x256xf32, #tpu.memory_space<vmem>>, %arg4: memref<1x4x256xf32, #tpu.memory_space<vmem>>) attributes {dimension_semantics = [#tpu.dimension_semantics<parallel>, #tpu.dimension_semantics<parallel>], iteration_bounds = array<i64: 2, 1>, scalar_prefetch = 0 : i64, scratch_operands = 0 : i64, tpu.core_type = #tpu.core_type<tc>, window_params = [{transform_indices = @transform_0, window_bounds = array<i64: 1, 4, 1>}, {transform_indices = @transform_1, window_bounds = array<i64: 1, 4, 256>}, {transform_indices = @transform_2, window_bounds = array<i64: 1, 4, 256>}]} {
    %c0 = arith.constant 0 : index
    %c0_0 = arith.constant 0 : index
    %c0_1 = arith.constant 0 : index
    %0 = vector.load %arg2[%c0, %c0_0, %c0_1] : memref<1x4x1xf32, #tpu.memory_space<vmem>>, vector<1x4x1xf32>
    %1 = vector.shape_cast %0 : vector<1x4x1xf32> to vector<4x1xf32>
    %c0_2 = arith.constant 0 : index
    %c0_3 = arith.constant 0 : index
    %c0_4 = arith.constant 0 : index
    %2 = vector.load %arg3[%c0_2, %c0_3, %c0_4] : memref<1x4x256xf32, #tpu.memory_space<vmem>>, vector<1x4x256xf32>
    %3 = vector.shape_cast %2 : vector<1x4x256xf32> to vector<4x256xf32>
    %4 = vector.broadcast %1 : vector<4x1xf32> to vector<4x256xf32>
    %5 = arith.mulf %4, %3 : vector<4x256xf32>
    %c0_5 = arith.constant 0 : index
    %c0_6 = arith.constant 0 : index
    %c0_7 = arith.constant 0 : index
    %6 = vector.load %arg4[%c0_5, %c0_6, %c0_7] : memref<1x4x256xf32, #tpu.memory_space<vmem>>, vector<1x4x256xf32>
    %7 = vector.shape_cast %6 : vector<1x4x256xf32> to vector<4x256xf32>
    %8 = vector.shape_cast %5 : vector<4x256xf32> to vector<1x4x256xf32>
    tpu.vector_store %arg4[%c0_5, %c0_6, %c0_7], %8 {strides = array<i32>} : memref<1x4x256xf32, #tpu.memory_space<vmem>>, vector<1x4x256xf32>,
    return
  }
  func.func @transform_0(%arg0: i32, %arg1: i32) -> (i32, i32, i32) {
    %c0_i32 = arith.constant 0 : i32
    %c0_i32_0 = arith.constant 0 : i32
    %c0_i32_1 = arith.constant 0 : i32
    return %arg0, %c0_i32, %c0_i32_0 : i32, i32, i32
  }
  func.func @transform_1(%arg0: i32, %arg1: i32) -> (i32, i32, i32) {
    %c0_i32 = arith.constant 0 : i32
    %c0_i32_0 = arith.constant 0 : i32
    return %arg0, %c0_i32, %arg1 : i32, i32, i32
  }
  func.func @transform_2(%arg0: i32, %arg1: i32) -> (i32, i32, i32) {
    %c0_i32 = arith.constant 0 : i32
    %c0_i32_0 = arith.constant 0 : i32
    return %arg0, %c0_i32, %arg1 : i32, i32, i32
  }
}

</mosaic_0001>

<bundles_post_ra>
// kernel: gsop_channel_attention.5
= control target key start
LH: loop header
LB: loop body
LE: loop exit
PB: predicated region body
PF: predicated region fallthrough
CT: control target
= control target key end

     0   :  { %s401_s9 = smov 0   ;;  %s403_s10 = smov 0   ;;  %s434_s0 = inlined_call_operand.vmem [shape: f32[2,4,1], index: 0, kind: input, shape index: {}]   ;;  %s435_s1 = inlined_call_operand.vmem [shape: f32[2,4,256], index: 1, kind: input, shape index: {}]   ;;  %s436_s2 = inlined_call_operand.vmem [shape: f32[2,4,256], index: 2, kind: output, shape index: {}]  }
   0x1   :  { %s405_s11 = smov 0  }
   0x2 LB: > { %s24_s12 = sadd.s32 1, %s379_s10  ;;  %p325_p0 = scmp.ge.s32.totalorder %s383_s11, 1  ;;  %s383_s11 = sphi %s405_s11, %s12_s11   ;;  %s379_s10 = sphi %s403_s10, %s438_s10   ;;  %s375_s9 = sphi %s401_s9, %s437_s9  }
   0x3   : > { %p26_p1 = scmp.ge.s32.totalorder %s24_s12, 2  ;;  %p142_p2 = scmp.lt.s32.totalorder %s383_s11, 3 }
   0x5   : > { %s440_s12 = smov (%p26_p1, %s24_s12), 0  ;;  %p143_p3 = pnand %p325_p0, %p142_p2 }
   0x6   : > { %p176_p4 = scmp.lt.s32.totalorder (!%p143_p3), %s375_s9, 1 }
   0x7   : > { %146 = sbr.rel (%p143_p3) target bundleno = 137 (0x89), region = 28 }
   0xc   : > { %v385_v0 = vmov 0   ;;  %s442_s9 = smov (!%p176_p4, %s375_s9), 1  ;;  %vm218_vm0 = vcmask 1043456  }
   0xd   : > { %360 = vset.pattern.permute.xlu0 %v385_v0  ;;  %s326_s13 = sshll.u32 %s442_s9, 2  ;;  %s333_s14 = sshll.u32 %s442_s9, 3 }
   0xe   : > { %s179_s17 = scalar_lea.vmem %s434_s0, %s326_s13  ;;  %s188_s20 = scalar_lea.vmem %s435_s1, %s333_s14 }
   0xf   : > { %v200_v1 = vld [vmem:[%s179_s17] sm:$0xf]  ;;  %s198_s23 = scalar_lea.vmem %s436_s2, %s333_s14 }
  0x10   : > { %v201_v2 = vld [vmem:[%s188_s20] sm:$0xff]  ;;  %204 = vperm.xlu0 %360, %v200_v1  }
  0x11   : > { %208 = vst [vmem:[#allocation1] ss:$2 sm:$0xff] %v201_v2 }
  0x18   : > { %v210_v3 = vld.sshfl [vmem:[#allocation1 + $0x8] sm:$0xff pattern:$0x75316420]  ;;  %v209_v4 = vld.sshfl [vmem:[#allocation1] sm:$0xff pattern:$0x75316420] }
  0x82   : > { %v205_v5 = vpop.permute.xlu0 %204 }
  0x83   : > { %v214_v6 = vmul.f32 %v210_v3, %v205_v5  ;;  %v213_v7 = vmul.f32 %v209_v4, %v205_v5 }
  0x85   : > { %v217_v8 = vrot.slane %v214_v6, 4 }
  0x87   : > { %v219_v9 = vsel %vm218_vm0, %v213_v7, %v217_v8 }
  0x88   : > { %221 = vst [vmem:[%s198_s23] sm:$0xff] %v219_v9 }
  0x89 PF: > { %s12_s11 = sadd.s32 1, %s383_s11   ;;  %s437_s9 = smov %s379_s10 }
  0x8a   : > { %p9_p5 = scmp.ge.s32.totalorder %s12_s11, 4   ;;  %s438_s10 = smov %s440_s12 }
  0x8c   :  { %11 = sbr.rel (!%p9_p5) target bundleno = 2 (0x2), region = 61 }

// kernel: gsop_channel_attention.4
= control target key start
LH: loop header
LB: loop body
LE: loop exit
PB: predicated region body
PF: predicated region fallthrough
CT: control target
= control target key end

     0   :  { %vm85_vm0 = vcmask 130048   ;;  %vm18_vm1 = vcmask 25600   ;;  %s862_s1 = inlined_call_operand.vmem [shape: f32[512,16], index: 1, kind: input, shape index: {}]   ;;  %s863_s2 = inlined_call_operand.vmem [shape: f32[4,512], index: 2, kind: input, shape index: {}]   ;;  %s864_s0 = inlined_call_operand.vmem [shape: f32[2,16], index: 0, kind: input, shape index: {}]   ;;  %s865_s3 = inlined_call_operand.vmem [shape: f32[2,4], index: 3, kind: output, shape index: {}]  }
   0x1   :  { %v68_v0 = vld [vmem:[%s862_s1 + $0x178] sm:$0xff]  ;;  %v67_v3 = vld [vmem:[%s862_s1 + $0x170] sm:$0xff]  ;;  %v66_v8 = vld [vmem:[%s862_s1 + $0x168] sm:$0xff] }
   0x2   :  { %v84_v1 = vld [vmem:[%s862_s1 + $0x1f8] sm:$0xff]  ;;  %526 = vmatpush.xpose.msk.msra.mxu2 %vm85_vm0, %v68_v0  ;;  %v83_v4 = vld [vmem:[%s862_s1 + $0x1f0] sm:$0xff]  ;;  %v82_v9 = vld [vmem:[%s862_s1 + $0x1e8] sm:$0xff] }
   0x3   :  { %543 = vmatpush.xpose.msk.msra.mxu3 %vm85_vm0, %v84_v1  ;;  %v36_v2 = vld [vmem:[%s862_s1 + $0x78] sm:$0xff]  ;;  %v35_v6 = vld [vmem:[%s862_s1 + $0x70] sm:$0xff]  ;;  %v34_v10 = vld [vmem:[%s862_s1 + $0x68] sm:$0xff] }
   0x4   :  { %492 = vmatpush.xpose.msk.msra.mxu0 %vm85_vm0, %v36_v2  ;;  %v52_v5 = vld [vmem:[%s862_s1 + $0xf8] sm:$0xff]  ;;  %v51_v7 = vld [vmem:[%s862_s1 + $0xf0] sm:$0xff]  ;;  %v50_v11 = vld [vmem:[%s862_s1 + $0xe8] sm:$0xff] }
   0x5   :  { %509 = vmatpush.xpose.msk.msra.mxu1 %vm85_vm0, %v52_v5  ;;  %v65_v12 = vld [vmem:[%s862_s1 + $0x160] sm:$0xff]  ;;  %v64_v16 = vld [vmem:[%s862_s1 + $0x158] sm:$0xff]  ;;  %v63_v20 = vld [vmem:[%s862_s1 + $0x150] sm:$0xff] }
   0x6   :  { %527 = vmatpush.xpose.msk.msra.mxu2 %vm85_vm0, %v67_v3  ;;  %v81_v13 = vld [vmem:[%s862_s1 + $0x1e0] sm:$0xff]  ;;  %v80_v17 = vld [vmem:[%s862_s1 + $0x1d8] sm:$0xff]  ;;  %v79_v21 = vld [vmem:[%s862_s1 + $0x1d0] sm:$0xff] }
   0x7   :  { %544 = vmatpush.xpose.msk.msra.mxu3 %vm85_vm0, %v83_v4  ;;  %v33_v14 = vld [vmem:[%s862_s1 + $0x60] sm:$0xff]  ;;  %v32_v18 = vld [vmem:[%s862_s1 + $0x58] sm:$0xff]  ;;  %v31_v22 = vld [vmem:[%s862_s1 + $0x50] sm:$0xff] }
   0x8   :  { %493 = vmatpush.xpose.msk.msra.mxu0 %vm85_vm0, %v35_v6  ;;  %v49_v15 = vld [vmem:[%s862_s1 + $0xe0] sm:$0xff]  ;;  %v48_v19 = vld [vmem:[%s862_s1 + $0xd8] sm:$0xff]  ;;  %v47_v23 = vld [vmem:[%s862_s1 + $0xd0] sm:$0xff] }
   0x9   :  { %510 = vmatpush.xpose.msk.msra.mxu1 %vm85_vm0, %v51_v7  ;;  %v62_v24 = vld [vmem:[%s862_s1 + $0x148] sm:$0xff]  ;;  %v61_v28 = vld [vmem:[%s862_s1 + $0x140] sm:$0xff]  ;;  %v60_v32 = vld [vmem:[%s862_s1 + $0x138] sm:$0xff] }
   0xa   :  { %528 = vmatpush.xpose.msk.msra.mxu2 %vm85_vm0, %v66_v8  ;;  %v78_v25 = vld [vmem:[%s862_s1 + $0x1c8] sm:$0xff]  ;;  %v77_v29 = vld [vmem:[%s862_s1 + $0x1c0] sm:$0xff]  ;;  %v76_v33 = vld [vmem:[%s862_s1 + $0x1b8] sm:$0xff] }
   0xb   :  { %545 = vmatpush.xpose.msk.msra.mxu3 %vm85_vm0, %v82_v9  ;;  %v30_v26 = vld [vmem:[%s862_s1 + $0x48] sm:$0xff]  ;;  %v29_v30 = vld [vmem:[%s862_s1 + $0x40] sm:$0xff]  ;;  %v28_v34 = vld [vmem:[%s862_s1 + $0x38] sm:$0xff] }
   0xc   :  { %494 = vmatpush.xpose.msk.msra.mxu0 %vm85_vm0, %v34_v10  ;;  %v46_v27 = vld [vmem:[%s862_s1 + $0xc8] sm:$0xff]  ;;  %v45_v31 = vld [vmem:[%s862_s1 + $0xc0] sm:$0xff]  ;;  %v44_v35 = vld [vmem:[%s862_s1 + $0xb8] sm:$0xff] }
   0xd   :  { %511 = vmatpush.xpose.msk.msra.mxu1 %vm85_vm0, %v50_v11  ;;  %v59_v36 = vld [vmem:[%s862_s1 + $0x130] sm:$0xff]  ;;  %v367_v38 = vld [vmem:[%s863_s2 + $0x8] sm:$0xff]  ;;  %v366_v39 = vld [vmem:[%s863_s2] sm:$0xff] }
   0xe   :  { %529 = vmatpush.xpose.msk.msra.mxu2 %vm85_vm0, %v65_v12  ;;  %v75_v37 = vld [vmem:[%s862_s1 + $0x1b0] sm:$0xff]  ;;  %372 = vst [vmem:[#allocation1 + $0x10] ss:$2 sm:$0xff] %v367_v38  ;;  %v58_v42 = vld [vmem:[%s862_s1 + $0x128] sm:$0xff]  ;;  %v57_v46 = vld [vmem:[%s862_s1 + $0x120] sm:$0xff] }
   0xf   :  { %546 = vmatpush.xpose.msk.msra.mxu3 %vm85_vm0, %v81_v13  ;;  %v27_v40 = vld [vmem:[%s862_s1 + $0x30] sm:$0xff]  ;;  %370 = vst [vmem:[#allocation1] ss:$2 sm:$0xff] %v366_v39  ;;  %v74_v43 = vld [vmem:[%s862_s1 + $0x1a8] sm:$0xff]  ;;  %v73_v47 = vld [vmem:[%s862_s1 + $0x1a0] sm:$0xff] }
  0x10   :  { %495 = vmatpush.xpose.msk.msra.mxu0 %vm85_vm0, %v33_v14  ;;  %v43_v41 = vld [vmem:[%s862_s1 + $0xb0] sm:$0xff]  ;;  %v26_v44 = vld [vmem:[%s862_s1 + $0x28] sm:$0xff]  ;;  %v25_v48 = vld [vmem:[%s862_s1 + $0x20] sm:$0xff] }
  0x11   :  { %512 = vmatpush.xpose.msk.msra.mxu1 %vm85_vm0, %v49_v15  ;;  %v42_v45 = vld [vmem:[%s862_s1 + $0xa8] sm:$0xff]  ;;  %v41_v49 = vld [vmem:[%s862_s1 + $0xa0] sm:$0xff]  ;;  %v56_v50 = vld [vmem:[%s862_s1 + $0x118] sm:$0xff]  ;;  %v566_v15 = vmov 0.0  }
  0x12   :  { %530 = vmatpush.xpose.msk.msra.mxu2 %vm85_vm0, %v64_v16  ;;  %v72_v51 = vld [vmem:[%s862_s1 + $0x198] sm:$0xff]  ;;  %v55_v54 = vld [vmem:[%s862_s1 + $0x110] sm:$0xff]  ;;  %v54_v58 = vld [vmem:[%s862_s1 + $0x108] sm:$0xff]  ;;  %19 = vst.msk [vmem:[#allocation2] sm:$0x3] %vm18_vm1, %v566_v15 }
  0x13   :  { %547 = vmatpush.xpose.msk.msra.mxu3 %vm85_vm0, %v80_v17  ;;  %v24_v52 = vld [vmem:[%s862_s1 + $0x18] sm:$0xff]  ;;  %v71_v55 = vld [vmem:[%s862_s1 + $0x190] sm:$0xff]  ;;  %v70_v59 = vld [vmem:[%s862_s1 + $0x188] sm:$0xff] }
  0x14   :  { %496 = vmatpush.xpose.msk.msra.mxu0 %vm85_vm0, %v32_v18  ;;  %v40_v53 = vld [vmem:[%s862_s1 + $0x98] sm:$0xff]  ;;  %v23_v56 = vld [vmem:[%s862_s1 + $0x10] sm:$0xff]  ;;  %v22_v60 = vld [vmem:[%s862_s1 + $0x8] sm:$0xff] }
  0x15   :  { %513 = vmatpush.xpose.msk.msra.mxu1 %vm85_vm0, %v48_v19  ;;  %v39_v57 = vld [vmem:[%s862_s1 + $0x90] sm:$0xff]  ;;  %v38_v61 = vld [vmem:[%s862_s1 + $0x88] sm:$0xff]  ;;  %v53_v62 = vld [vmem:[%s862_s1 + $0x100] sm:$0xff] }
  0x16   :  { %531 = vmatpush.xpose.msk.msra.mxu2 %vm85_vm0, %v63_v20  ;;  %v69_v63 = vld [vmem:[%s862_s1 + $0x180] sm:$0xff]  ;;  %v375_v1 = vld.sshfl [vmem:[#allocation1 + $0x10] sm:$0xff pattern:$0x75316420] }
  0x17   :  { %548 = vmatpush.xpose.msk.msra.mxu3 %vm85_vm0, %v79_v21  ;;  %v21_v0 = vld [vmem:[%s862_s1] sm:$0xff]  ;;  %v376_v3 = vld.sshfl [vmem:[#allocation1 + $0x18] sm:$0xff pattern:$0x75316420] }
  0x18   :  { %497 = vmatpush.xpose.msk.msra.mxu0 %vm85_vm0, %v31_v22  ;;  %v37_v2 = vld [vmem:[%s862_s1 + $0x80] sm:$0xff]  ;;  %v374_v5 = vld.sshfl [vmem:[#allocation1 + $0x8] sm:$0xff pattern:$0x75316420] }
  0x19   :  { %514 = vmatpush.xpose.msk.msra.mxu1 %vm85_vm0, %v47_v23  ;;  %v20_v4 = vld [vmem:[%s864_s0] sm:$0x3]  ;;  %v365_v22 = vld [vmem:[#allocation2] sm:$0x3] }
  0x1a   :  { %532 = vmatpush.xpose.msk.msra.mxu2 %vm85_vm0, %v62_v24  ;;  %v373_v6 = vld.sshfl [vmem:[#allocation1] sm:$0xff pattern:$0x75316420] }
  0x1b   :  { %549 = vmatpush.xpose.msk.msra.mxu3 %vm85_vm0, %v78_v25 }
  0x1c   :  { %498 = vmatpush.xpose.msk.msra.mxu0 %vm85_vm0, %v30_v26 }
  0x1d   :  { %515 = vmatpush.xpose.msk.msra.mxu1 %vm85_vm0, %v46_v27 }
  0x1e   :  { %533 = vmatpush.xpose.msk.msra.mxu2 %vm85_vm0, %v61_v28 }
  0x1f   :  { %550 = vmatpush.xpose.msk.msra.mxu3 %vm85_vm0, %v77_v29 }
  0x20   :  { %499 = vmatpush.xpose.msk.msra.mxu0 %vm85_vm0, %v29_v30 }
  0x21   :  { %516 = vmatpush.xpose.msk.msra.mxu1 %vm85_vm0, %v45_v31 }
  0x22   :  { %534 = vmatpush.xpose.msk.msra.mxu2 %vm85_vm0, %v60_v32 }
  0x23   :  { %551 = vmatpush.xpose.msk.msra.mxu3 %vm85_vm0, %v76_v33 }
  0x24   :  { %500 = vmatpush.xpose.msk.msra.mxu0 %vm85_vm0, %v28_v34 }
  0x25   :  { %517 = vmatpush.xpose.msk.msra.mxu1 %vm85_vm0, %v44_v35 }
  0x26   :  { %535 = vmatpush.xpose.msk.msra.mxu2 %vm85_vm0, %v59_v36 }
  0x27   :  { %552 = vmatpush.xpose.msk.msra.mxu3 %vm85_vm0, %v75_v37 }
  0x28   :  { %501 = vmatpush.xpose.msk.msra.mxu0 %vm85_vm0, %v27_v40 }
  0x29   :  { %518 = vmatpush.xpose.msk.msra.mxu1 %vm85_vm0, %v43_v41 }
  0x2a   :  { %536 = vmatpush.xpose.msk.msra.mxu2 %vm85_vm0, %v58_v42 }
  0x2b   :  { %553 = vmatpush.xpose.msk.msra.mxu3 %vm85_vm0, %v74_v43 }
  0x2c   :  { %502 = vmatpush.xpose.msk.msra.mxu0 %vm85_vm0, %v26_v44 }
  0x2d   :  { %519 = vmatpush.xpose.msk.msra.mxu1 %vm85_vm0, %v42_v45 }
  0x2e   :  { %537 = vmatpush.xpose.msk.msra.mxu2 %vm85_vm0, %v57_v46 }
  0x2f   :  { %554 = vmatpush.xpose.msk.msra.mxu3 %vm85_vm0, %v73_v47 }
  0x30   :  { %503 = vmatpush.xpose.msk.msra.mxu0 %vm85_vm0, %v25_v48 }
  0x31   :  { %520 = vmatpush.xpose.msk.msra.mxu1 %vm85_vm0, %v41_v49 }
  0x32   :  { %538 = vmatpush.xpose.msk.msra.mxu2 %vm85_vm0, %v56_v50 }
  0x33   :  { %555 = vmatpush.xpose.msk.msra.mxu3 %vm85_vm0, %v72_v51 }
  0x34   :  { %504 = vmatpush.xpose.msk.msra.mxu0 %vm85_vm0, %v24_v52 }
  0x35   :  { %521 = vmatpush.xpose.msk.msra.mxu1 %vm85_vm0, %v40_v53 }
  0x36   :  { %539 = vmatpush.xpose.msk.msra.mxu2 %vm85_vm0, %v55_v54 }
  0x37   :  { %556 = vmatpush.xpose.msk.msra.mxu3 %vm85_vm0, %v71_v55 }
  0x38   :  { %505 = vmatpush.xpose.msk.msra.mxu0 %vm85_vm0, %v23_v56 }
  0x39   :  { %522 = vmatpush.xpose.msk.msra.mxu1 %vm85_vm0, %v39_v57 }
  0x3a   :  { %540 = vmatpush.xpose.msk.msra.mxu2 %vm85_vm0, %v54_v58 }
  0x3b   :  { %557 = vmatpush.xpose.msk.msra.mxu3 %vm85_vm0, %v70_v59 }
  0x3c   :  { %506 = vmatpush.xpose.msk.msra.mxu0 %vm85_vm0, %v22_v60 }
  0x3d   :  { %523 = vmatpush.xpose.msk.msra.mxu1 %vm85_vm0, %v38_v61 }
  0x3e   :  { %541 = vmatpush.xpose.msk.msra.mxu2 %vm85_vm0, %v53_v62 }
  0x3f   :  { %558 = vmatpush.xpose.msk.msra.mxu3 %vm85_vm0, %v69_v63 }
  0x40   :  { %507 = vmatpush.xpose.msk.msra.mxu0 %vm85_vm0, %v21_v0 }
  0x41   :  { %524 = vmatpush.xpose.msk.msra.mxu1 %vm85_vm0, %v37_v2  ;;  %542 = vmatmul.msk.f32.vlgmr.msra.gmra.mxu2 %vm85_vm0, %v20_v4 }
  0x42   :  { %436 = vmatpush.xpose.msrb.mxu2 %v375_v1  ;;  %559 = vmatmul.msk.f32.vlgmr.msra.gmra.mxu3 %vm85_vm0, %v20_v4 }
  0x43   :  { %456 = vmatpush.xpose.msrb.mxu3 %v376_v3  ;;  %508 = vmatmul.msk.f32.vlgmr.msra.gmra.mxu0 %vm85_vm0, %v20_v4 }
  0x44   :  { %525 = vmatmul.msk.f32.vlgmr.msra.gmra.mxu1 %vm85_vm0, %v20_v4  ;;  %396 = vmatpush.xpose.msrb.mxu0 %v373_v6 }
  0x45   :  { %416 = vmatpush.xpose.msrb.mxu1 %v374_v5 }
  0xc0   :  { %v298_v7 = vpop.f32.mrf.mxu0 }
  0xc1   :  { %v361_v8 = vmax.f32 %v298_v7, 0.0  ;;  %v318_v9 = vpop.f32.mrf.mxu1 }
  0xc2   :  { %v362_v10 = vmax.f32 %v318_v9, 0.0 }
  0xc3   :  { %397 = vmatmul.f32.vlgmr.msrb.gmra.mxu0 %v361_v8 }
  0xc4   :  { %417 = vmatmul.f32.vlgmr.msrb.gmra.mxu1 %v362_v10  ;;  %v338_v11 = vpop.f32.mrf.mxu2 }
  0xc5   :  { %v358_v12 = vpop.f32.mrf.mxu3  ;;  %v363_v13 = vmax.f32 %v338_v11, 0.0 }
  0xc6   :  { %v364_v14 = vmax.f32 %v358_v12, 0.0 }
  0xc7   :  { %437 = vmatmul.f32.vlgmr.msrb.gmra.mxu2 %v363_v13 }
  0xc8   :  { %457 = vmatmul.f32.vlgmr.msrb.gmra.mxu3 %v364_v14 }
 0x140   :  { %v398_v16 = vpop.f32.mrf.mxu0 }
 0x141   :  { %v418_v17 = vpop.f32.mrf.mxu1 }
 0x142   :  { %v419_v18 = vadd.f32 %v418_v17, %v398_v16 }
 0x14a   :  { %v438_v19 = vpop.f32.mrf.mxu2 }
 0x14b   :  { %v458_v20 = vpop.f32.mrf.mxu3  ;;  %v439_v21 = vadd.f32 %v438_v19, %v419_v18 }
 0x14d   :  { %v459_v23 = vadd.f32 %v458_v20, %v439_v21 }
 0x14f   :  { %v461_v24 = vadd.f32 %v459_v23, %v365_v22 }
 0x151   :  { %463 = vst.msk [vmem:[#allocation2] sm:$0x3] %vm18_vm1, %v461_v24 }
 0x158   :  { %v467_v25 = vld [vmem:[#allocation2] sm:$0x3] }
 0x159   :  { %v560_v26 = vmul.f32 -1.442695, %v467_v25 }
 0x15b   :  { %562 = vpow2.f32 %v560_v26 }
 0x161   :  { %v563_v27 = vpop.eup %562 }
 0x162   :  { %v471_v28 = vadd.f32 1.0, %v563_v27 }
 0x164   :  { %564 = vrcp.f32 %v471_v28  ;;  %v483_v32 = vand.u32 2147483648, %v471_v28  ;;  %v481_v34 = vand.u32 2147483647, %v471_v28  ;;  %vm477_vm3 = vweird.f32 %v471_v28 }
 0x166   :  { %v484_v36 = vor.u32 1.1754944e-38, %v483_v32  ;;  %vm482_vm5 = vcmp.eq.f32.partialorder %v481_v34, 8.507059e+37 }
 0x16a   :  { %v565_v29 = vpop.eup %564 }
 0x16b   :  { %v473_v30 = vmul.f32 %v565_v29, %v471_v28  ;;  %vm478_vm2 = vweird.f32 %v565_v29 }
 0x16c   :  { %vm479_vm4 = vmor %vm477_vm3, %vm478_vm2 }
 0x16d   :  { %v474_v31 = vsub.f32 1.0, %v473_v30 }
 0x16f   :  { %v475_v33 = vmul.f32 %v565_v29, %v474_v31 }
 0x171   :  { %v476_v35 = vadd.f32 %v565_v29, %v475_v33 }
 0x173   :  { %v480_v37 = vsel %vm479_vm4, %v565_v29, %v476_v35 }
 0x174   :  { %v485_v38 = vsel %vm482_vm5, %v484_v36, %v480_v37 }
 0x175   :  { %487 = vst.msk [vmem:[%s865_s3] sm:$0x3] %vm18_vm1, %v485_v38 }

// kernel: gsop_channel_attention.3
= control target key start
LH: loop header
LB: loop body
LE: loop exit
PB: predicated region body
PF: predicated region fallthrough
CT: control target
= control target key end

     0   :  { %vm46_vm0 = vcmask 1043456   ;;  %vm42_vm1 = vcmask 31744   ;;  %v282_v0 = vlaneseq  ;;  %v490_v4 = vmov 0   ;;  %s651_s0 = inlined_call_operand.vmem [shape: f32[2,4,64], index: 0, kind: input, shape index: {}]   ;;  %s652_s1 = inlined_call_operand.vmem [shape: f32[4,4], index: 1, kind: input, shape index: {}]   ;;  %s653_s2 = inlined_call_operand.vmem [shape: f32[4,1], index: 2, kind: input, shape index: {}]   ;;  %s654_s4 = inlined_call_operand.vmem [shape: f32[4,4], index: 4, kind: input, shape index: {}]   ;;  %s655_s3 = inlined_call_operand.vmem [shape: f32[4,4,4], index: 3, kind: input, shape index: {}]   ;;  %s656_s5 = inlined_call_operand.vmem [shape: f32[2,4,4], index: 5, kind: output, shape index: {}]  }
   0x1   :  { %v33_v1 = vld [vmem:[%s651_s0] sm:$0xf]  ;;  %v468_v2 = vld [vmem:[%s651_s0 + $0x4] sm:$0xf]  ;;  %479 = vset.pattern.permute.xlu0 %v490_v4  ;;  %vm27_vm2 = vcmask 3072   ;;  %v491_v17 = vmov 0.0  }
   0x2   :  { %v35_v3 = vld [vmem:[%s652_s1] sm:$0xf]  ;;  %v34_v5 = vmax.f32 %v33_v1, 0.0  ;;  %v136_v6 = vmax.f32 %v468_v2, 0.0  ;;  %v540_v9 = vshrl.u32 %v282_v0, 7  ;;  %vm72_vm3 = vcmask 523264  }
   0x3   :  { %v137_v7 = vld [vmem:[%s652_s1] sm:$0xf]  ;;  %28 = vst.msk [vmem:[#allocation3] sm:$0xf] %vm27_vm2, %v491_v17  ;;  %vm100_vm4 = vcmask 519168   ;;  %v492_v26 = vmov 1.0  }
   0x4   :  { %v36_v8 = vld [vmem:[%s653_s2] sm:$0xf]  ;;  %462 = vmatpush.msk.msra.mxu0 %vm46_vm0, %v34_v5  ;;  %469 = vmatpush.msk.msra.mxu3 %vm46_vm0, %v136_v6  ;;  %29 = vst.msk [vmem:[#allocation3 + $0x4] sm:$0xf] %vm27_vm2, %v491_v17  ;;  %vm24_vm5 = vcmask 27648   ;;  %vm30_vm6 = vcmask 24576  }
   0x5   :  { %39 = vperm.xlu0 %479, %v36_v8   ;;  %463 = vmatmul.msk.f32.vlgmr.msra.gmra.mxu0 %vm42_vm1, %v35_v3  ;;  %v279_v10 = vld [vmem:[%s654_s4] sm:$0xf]  ;;  %25 = vst.msk [vmem:[#allocation2] sm:$0xf] %vm24_vm5, %v491_v17  ;;  %v249_v6 = vld [vmem:[%s655_s3 + $0x8] sm:$0xf] }
   0x6   :  { %470 = vmatmul.msk.f32.vlgmr.msra.gmra.mxu3 %vm42_vm1, %v137_v7  ;;  %480 = vset.pattern.permute.xlu1 %v540_v9  ;;  %v138_v11 = vld [vmem:[%s653_s2] sm:$0xf]  ;;  %v281_v12 = vperm.slane %v279_v10, 0  ;;  %v302_v13 = vperm.slane %v279_v10, 3  ;;  %v288_v16 = vperm.slane %v279_v10, 1  ;;  %v295_v32 = vperm.slane %v279_v10, 2 }
   0x7   :  { %481 = vset.pattern.permute.xlu2 %v540_v9  ;;  %v558_v14 = vld [vmem:[%s654_s4] sm:$0xf]  ;;  %26 = vst.msk [vmem:[#allocation2 + $0x4] sm:$0xf] %vm24_vm5, %v491_v17  ;;  %v248_v7 = vld [vmem:[%s655_s3 + $0x4] sm:$0xf] }
   0x8   :  { %v403_v15 = vperm.slane %v558_v14, 1  ;;  %v396_v29 = vperm.slane %v558_v14, 0  ;;  %v410_v34 = vperm.slane %v558_v14, 2  ;;  %31 = vst.msk [vmem:[#allocation4] sm:$0x1] %vm30_vm6, %v491_v17  ;;  %v417_v52 = vperm.slane %v558_v14, 3 }
   0x9   :  { %32 = vst.msk [vmem:[#allocation4 + $0x1] sm:$0x1] %vm30_vm6, %v491_v17  ;;  %v247_v2 = vld [vmem:[%s655_s3] sm:$0xf]  ;;  %vm339_vm7 = vcmask 1041409   ;;  %vm341_vm8 = vcmask 1042434  }
   0xa   :  { %v99_v35 = vld [vmem:[#allocation3] sm:$0xf]  ;;  %vm343_vm9 = vcmask 1043459  }
   0xb   :  { %v199_v38 = vld [vmem:[#allocation3 + $0x4] sm:$0xf] }
   0xc   :  { %v71_v42 = vld [vmem:[#allocation2] sm:$0xf] }
   0xd   :  { %141 = vperm.xlu0 %479, %v138_v11  }
   0xe   :  { %286 = vperm.xlu1 %480, %v281_v12   ;;  %v172_v45 = vld [vmem:[#allocation2 + $0x4] sm:$0xf] }
   0xf   :  { %293 = vperm.xlu2 %481, %v288_v16   ;;  %v107_v46 = vld [vmem:[#allocation4] sm:$0x1] }
  0x10   :  { %v206_v54 = vld [vmem:[#allocation4 + $0x1] sm:$0x1] }
  0x15   :  { %482 = vset.pattern.permute.xlu0 %v540_v9 }
  0x16   :  { %307 = vperm.xlu1 %480, %v302_v13  }
  0x17   :  { %401 = vperm.xlu2 %481, %v396_v29  }
  0x1d   :  { %300 = vperm.xlu0 %482, %v295_v32  }
  0x1e   :  { %408 = vperm.xlu1 %480, %v403_v15  }
  0x1f   :  { %483 = vset.pattern.permute.xlu2 %v490_v4 }
  0x25   :  { %415 = vperm.xlu0 %482, %v410_v34  }
  0x26   :  { %485 = vset.pattern.permute.xlu1 %v490_v4 }
  0x2d   :  { %487 = vset.pattern.permute.xlu0 %v490_v4 }
  0x69   :  { %v594_v53 = vpop.permute.xlu2 %293 }
  0x71   :  { %v597_v57 = vpop.permute.xlu2 %401 }
  0x77   :  { %v40_v18 = vpop.permute.xlu0 %39 }
  0x7f   :  { %v142_v23 = vpop.permute.xlu0 %141 }
  0x80   :  { %v573_v30 = vpop.permute.xlu1 %286 }
  0x82   :  { %v67_v19 = vpop.f32.mrf.mxu0 }
  0x83   :  { %v68_v20 = vadd.f32 %v67_v19, %v40_v18  ;;  %v250_v18 = vld [vmem:[%s655_s3 + $0xc] sm:$0xf] }
  0x85   :  { %v70_v21 = vmax.f32 %v68_v20, 0.0 }
  0x87   :  { %464 = vmatpush.xpose.msk.msra.mxu1 %vm72_vm3, %v70_v21  ;;  %466 = vmatpush.xpose.msk.msra.mxu2 %vm72_vm3, %v70_v21  ;;  %v101_v22 = vsel %vm100_vm4, %v70_v21, 0.0 }
  0x88   :  { %102 = vadd.xlane.f32.xlu1 %v101_v22  ;;  %v578_v31 = vpop.permute.xlu1 %307 }
  0x89   :  { %v167_v24 = vpop.f32.mrf.mxu3 }
  0x8a   :  { %v168_v25 = vadd.f32 %v167_v24, %v142_v23  ;;  %465 = vmatmul.msk.f32.vlgmr.msra.gmra.mxu1 %vm72_vm3, %v70_v21  ;;  %467 = vmatmul.msk.f32.vlgmr.msra.gmra.mxu2 %vm72_vm3, %v492_v26 }
  0x8c   :  { %v170_v27 = vmax.f32 %v168_v25, 0.0 }
  0x8e   :  { %471 = vmatpush.xpose.msk.msrb.mxu0 %vm72_vm3, %v170_v27  ;;  %473 = vmatpush.xpose.msk.msrb.mxu3 %vm72_vm3, %v170_v27  ;;  %v200_v28 = vsel %vm100_vm4, %v170_v27, 0.0 }
  0x90   :  { %201 = vadd.xlane.f32.xlu1 %v200_v28  ;;  %v580_v33 = vpop.permute.xlu1 %408  ;;  %v362_v28 = vld [vmem:[%s655_s3] sm:$0xf] }
  0x91   :  { %472 = vmatmul.msk.f32.vlgmr.msrb.gmra.mxu0 %vm72_vm3, %v170_v27  ;;  %474 = vmatmul.msk.f32.vlgmr.msrb.gmra.mxu3 %vm72_vm3, %v492_v26 }
  0xfb   :  { %v103_v36 = vpop.xlane.xlu1 %102 }
  0xfc   :  { %v104_v37 = vadd.f32 %v103_v36, %v99_v35  ;;  %v363_v35 = vld [vmem:[%s655_s3 + $0x4] sm:$0xf]  ;;  %v364_v36 = vld [vmem:[%s655_s3 + $0x8] sm:$0xf] }
  0xfe   :  { %106 = vst.msk [vmem:[#allocation3] sm:$0xf] %vm27_vm2, %v104_v37 }
 0x103   :  { %v202_v39 = vpop.xlane.xlu1 %201 }
 0x104   :  { %v203_v40 = vadd.f32 %v202_v39, %v199_v38 }
 0x105   :  { %v232_v41 = vld [vmem:[#allocation3] sm:$0xf] }
 0x106   :  { %204 = vst.msk [vmem:[#allocation3 + $0x4] sm:$0xf] %vm27_vm2, %v203_v40  ;;  %236 = vperm.xlu2 %483, %v232_v41  }
 0x107   :  { %v93_v43 = vpop.f32.mrf.mxu1 }
 0x108   :  { %v96_v44 = vadd.f32 %v93_v43, %v71_v42 }
 0x10a   :  { %98 = vst.msk [vmem:[#allocation2] sm:$0xf] %vm24_vm5, %v96_v44 }
 0x10d   :  { %v347_v48 = vld [vmem:[#allocation3 + $0x4] sm:$0xf]  ;;  %v128_v49 = vpop.f32.mrf.mxu2 }
 0x10e   :  { %v193_v47 = vpop.f32.mrf.mxu0  ;;  %351 = vperm.xlu1 %485, %v347_v48   ;;  %484 = vset.pattern.permute.xlu2 %v540_v9  ;;  %v131_v51 = vadd.f32 %v128_v49, %v107_v46 }
 0x10f   :  { %v196_v50 = vadd.f32 %v193_v47, %v172_v45  ;;  %v365_v47 = vld [vmem:[%s655_s3 + $0xc] sm:$0xf] }
 0x110   :  { %133 = vst.msk [vmem:[#allocation4] sm:$0x1] %vm30_vm6, %v131_v51 }
 0x111   :  { %197 = vst.msk [vmem:[#allocation2 + $0x4] sm:$0xf] %vm24_vm5, %v196_v50  ;;  %v243_v62 = vld [vmem:[#allocation2] sm:$0xf]  ;;  %v301_v50 = vpop.permute.xlu0 %300 }
 0x114   :  { %v224_v55 = vpop.f32.mrf.mxu3 }
 0x115   :  { %v227_v56 = vadd.f32 %v224_v55, %v206_v54 }
 0x116   :  { %422 = vperm.xlu2 %484, %v417_v52  }
 0x117   :  { %228 = vst.msk [vmem:[#allocation4 + $0x1] sm:$0x1] %vm30_vm6, %v227_v56  ;;  %v488_v58 = vld [vmem:[#allocation4] ss:$0 sm:$0xff] }
 0x118   :  { %v358_v25 = vld [vmem:[#allocation2 + $0x4] sm:$0xf] }
 0x119   :  { %v416_v52 = vpop.permute.xlu0 %415 }
 0x11e   :  { %486 = vset.pattern.permute.xlu2 %v490_v4  ;;  %v489_v21 = vld [vmem:[#allocation4 + $0x1] ss:$0 sm:$0xff] }
 0x160   :  { %v237_v59 = vpop.permute.xlu2 %236 }
 0x161   :  { %v242_v60 = vmul.f32 %v488_v58, %v237_v59 }
 0x163   :  { %v244_v61 = vmul.f32 0.015625, %v242_v60 }
 0x165   :  { %v245_v63 = vsub.f32 %v243_v62, %v244_v61 }
 0x167   :  { %v246_v1 = vmul.f32 0.015625, %v245_v63 }
 0x169   :  { %v255_v3 = vperm.slane %v246_v1, 0  ;;  %v253_v4 = vrot.slane %v246_v1, 2  ;;  %v252_v5 = vrot.slane %v246_v1, 1  ;;  %v254_v11 = vrot.slane %v246_v1, 3 }
 0x16b   :  { %v263_v8 = vmul.f32 %v255_v3, %v247_v2  ;;  %v257_v9 = vperm.slane %v253_v4, 0  ;;  %v256_v10 = vperm.slane %v252_v5, 0  ;;  %v258_v17 = vperm.slane %v254_v11, 0 }
 0x16d   :  { %v267_v12 = vsel %vm24_vm5, %v263_v8, 0.0  ;;  %v265_v13 = vmul.f32 %v257_v9, %v249_v6  ;;  %v264_v14 = vmul.f32 %v256_v10, %v248_v7  ;;  %v266_v19 = vmul.f32 %v258_v17, %v250_v18 }
 0x16e   :  { %268 = vadd.xlane.f32.xlu2 %v267_v12 }
 0x16f   :  { %v273_v15 = vsel %vm24_vm5, %v265_v13, 0.0  ;;  %v270_v16 = vsel %vm24_vm5, %v264_v14, 0.0  ;;  %v276_v20 = vsel %vm24_vm5, %v266_v19, 0.0 }
 0x170   :  { %274 = vadd.xlane.f32.xlu1 %v273_v15  ;;  %271 = vadd.xlane.f32.xlu0 %v270_v16  ;;  %v423_v51 = vpop.permute.xlu2 %422 }
 0x178   :  { %277 = vadd.xlane.f32.xlu1 %v276_v20 }
 0x180   :  { %v352_v22 = vpop.permute.xlu1 %351 }
 0x181   :  { %v357_v23 = vmul.f32 %v489_v21, %v352_v22 }
 0x183   :  { %v359_v24 = vmul.f32 0.015625, %v357_v23 }
 0x185   :  { %v360_v26 = vsub.f32 %v358_v25, %v359_v24 }
 0x187   :  { %v361_v27 = vmul.f32 0.015625, %v360_v26 }
 0x189   :  { %v370_v29 = vperm.slane %v361_v27, 0  ;;  %v367_v32 = vrot.slane %v361_v27, 1  ;;  %v368_v34 = vrot.slane %v361_v27, 2  ;;  %v369_v40 = vrot.slane %v361_v27, 3 }
 0x18b   :  { %v378_v37 = vmul.f32 %v370_v29, %v362_v28  ;;  %v371_v38 = vperm.slane %v367_v32, 0  ;;  %v372_v39 = vperm.slane %v368_v34, 0  ;;  %v373_v46 = vperm.slane %v369_v40, 0 }
 0x18d   :  { %v382_v41 = vsel %vm24_vm5, %v378_v37, 0.0  ;;  %v379_v42 = vmul.f32 %v371_v38, %v363_v35  ;;  %v380_v43 = vmul.f32 %v372_v39, %v364_v36  ;;  %v381_v48 = vmul.f32 %v373_v46, %v365_v47 }
 0x18e   :  { %383 = vadd.xlane.f32.xlu1 %v382_v41 }
 0x18f   :  { %v385_v44 = vsel %vm24_vm5, %v379_v42, 0.0  ;;  %v388_v45 = vsel %vm24_vm5, %v380_v43, 0.0  ;;  %v391_v49 = vsel %vm24_vm5, %v381_v48, 0.0 }
 0x190   :  { %386 = vadd.xlane.f32.xlu2 %v385_v44  ;;  %389 = vadd.xlane.f32.xlu0 %v388_v45 }
 0x198   :  { %392 = vadd.xlane.f32.xlu0 %v391_v49 }
 0x1e1   :  { %v269_v54 = vpop.xlane.xlu2 %268 }
 0x1e2   :  { %v313_v55 = vadd.f32 %v573_v30, %v269_v54 }
 0x1e3   :  { %v275_v56 = vpop.xlane.xlu1 %274  ;;  %v272_v58 = vpop.xlane.xlu0 %271 }
 0x1e4   :  { %v314_v59 = vadd.f32 %v594_v53, %v272_v58  ;;  %322 = vperm.xlu1 %485, %v313_v55   ;;  %v315_v60 = vadd.f32 %v301_v50, %v275_v56 }
 0x1e6   :  { %325 = vperm.xlu2 %486, %v314_v59  }
 0x1eb   :  { %v278_v61 = vpop.xlane.xlu1 %277 }
 0x1ec   :  { %v316_v62 = vadd.f32 %v578_v31, %v278_v61  ;;  %328 = vperm.xlu1 %485, %v315_v60   ;;  %v334_v31 = vand.u32 127, %v282_v0 }
 0x1ee   :  { %331 = vperm.xlu2 %486, %v316_v62  }
 0x201   :  { %v384_v63 = vpop.xlane.xlu1 %383 }
 0x202   :  { %v428_v1 = vadd.f32 %v597_v57, %v384_v63 }
 0x203   :  { %v387_v2 = vpop.xlane.xlu2 %386  ;;  %v390_v3 = vpop.xlane.xlu0 %389 }
 0x204   :  { %v429_v4 = vadd.f32 %v580_v33, %v387_v2  ;;  %437 = vperm.xlu1 %485, %v428_v1   ;;  %v430_v30 = vadd.f32 %v416_v52, %v390_v3 }
 0x206   :  { %440 = vperm.xlu2 %486, %v429_v4  }
 0x20b   :  { %v393_v5 = vpop.xlane.xlu0 %392 }
 0x20c   :  { %v431_v53 = vadd.f32 %v423_v51, %v393_v5  ;;  %443 = vperm.xlu1 %485, %v430_v30  }
 0x20e   :  { %446 = vperm.xlu0 %487, %v431_v53  }
 0x240   :  { %v326_v6 = vpop.permute.xlu2 %325 }
 0x241   :  { %v336_v10 = vperm.slane %v326_v6, %v334_v31 }
 0x248   :  { %v332_v9 = vpop.permute.xlu2 %331 }
 0x249   :  { %v338_v33 = vperm.slane %v332_v9, %v334_v31 }
 0x256   :  { %v323_v7 = vpop.permute.xlu1 %322 }
 0x257   :  { %v335_v8 = vperm.slane %v323_v7, %v334_v31 }
 0x259   :  { %v340_v12 = vsel %vm339_vm7, %v336_v10, %v335_v8 }
 0x25e   :  { %v329_v57 = vpop.permute.xlu1 %328 }
 0x25f   :  { %v337_v11 = vperm.slane %v329_v57, %v334_v31 }
 0x260   :  { %v441_v15 = vpop.permute.xlu2 %440 }
 0x261   :  { %v342_v13 = vsel %vm341_vm8, %v337_v11, %v340_v12  ;;  %v449_v17 = vperm.slane %v441_v15, %v334_v31 }
 0x262   :  { %v344_v14 = vsel %vm343_vm9, %v338_v33, %v342_v13 }
 0x263   :  { %346 = vst.msk [vmem:[%s656_s5] sm:$0xf] %vm24_vm5, %v344_v14 }
 0x276   :  { %v438_v0 = vpop.permute.xlu1 %437 }
 0x277   :  { %v448_v16 = vperm.slane %v438_v0, %v334_v31 }
 0x279   :  { %v452_v20 = vsel %vm339_vm7, %v449_v17, %v448_v16 }
 0x27e   :  { %v444_v18 = vpop.permute.xlu1 %443 }
 0x27f   :  { %v450_v19 = vperm.slane %v444_v18, %v334_v31 }
 0x280   :  { %v447_v21 = vpop.permute.xlu0 %446 }
 0x281   :  { %v453_v22 = vsel %vm341_vm8, %v450_v19, %v452_v20  ;;  %v451_v23 = vperm.slane %v447_v21, %v334_v31 }
 0x283   :  { %v454_v24 = vsel %vm343_vm9, %v451_v23, %v453_v22 }
 0x284   :  { %475 = vst.msk [vmem:[%s656_s5 + $0x4] sm:$0xf] %vm24_vm5, %v454_v24 }

</bundles_post_ra>
